<compile_context>
chip_gen: v7x
topology: tpu7x:2x2x1
jax: 0.10.0
libtpu: 0.0.40
codegen_flags: <defaults>
</compile_context>

<pallas_src>
import functools

import jax
import jax.numpy as jnp
from jax.experimental import pallas as pl
from jax.experimental.pallas import tpu as pltpu


# ---------------------------------------------------------------------------
# Kernel body: one grid step produces a (Cout, ts) output slab for BOTH convs.
# ---------------------------------------------------------------------------
def _downsample_pair_kernel(px_ref, ps_ref, wx_ref, ws_ref, bx_ref, bs_ref,
                            ox_ref, os_ref):
    """px/ps: (1, K, ts) patches; wx/ws: (Cout, K); bx/bs: (Cout, 1) f32;
    ox/os: (1, Cout, ts) channel-major, lane-dense outputs."""
    acc_x = jnp.dot(wx_ref[...], px_ref[0], preferred_element_type=jnp.float32)
    ox_ref[0] = (acc_x + bx_ref[...]).astype(ox_ref.dtype)

    acc_s = jnp.dot(ws_ref[...], ps_ref[0], preferred_element_type=jnp.float32)
    os_ref[0] = (acc_s + bs_ref[...]).astype(os_ref.dtype)


# ---------------------------------------------------------------------------
# Wrapper helpers
# ---------------------------------------------------------------------------
def _space_to_depth(x, compute_dtype, collapse_batch):
    """NCHW -> K-major patches for a 2x2/stride-2 conv (K ordered (ci, kh, kw)).

    collapse_batch=False: (N, C, H, W) -> (N, K, OH*OW)
    collapse_batch=True : (N, C, H, W) -> (1, K, N*OH*OW)  (batch on the lane axis)
    """
    N, C, H, W = x.shape
    OH, OW = H // 2, W // 2
    p = x.reshape(N, C, OH, 2, OW, 2)
    if collapse_batch:
        p = p.transpose(1, 3, 5, 0, 2, 4).reshape(1, C * 4, N * OH * OW)
    else:
        p = p.transpose(0, 1, 3, 5, 2, 4).reshape(N, C * 4, OH * OW)
    return p.astype(compute_dtype)


def _tpu_vmem_capacity_bytes():
    """Physical VMEM per core; conservative default if the query is unavailable."""
    try:
        info = pltpu.get_tpu_info()
        cap = getattr(info, "vmem_capacity_bytes", None)
        if cap:
            return int(cap)
    except Exception:
        pass
    return 64 * 2 ** 20  # v7x-sized conservative default


def _vmem_bytes(ts, K, Cout, in_item, out_item, weight_bufs):
    """Working-set estimate for one pipelined grid step."""
    return (2 * 2 * K * ts * in_item          # two patch streams, double-buffered
            + 2 * 2 * Cout * ts * out_item    # two output streams, double-buffered
            + 2 * weight_bufs * Cout * K * in_item   # two resident weight blocks
            + 2 * 2 * Cout * 4)               # two f32 bias blocks


def _pick_spatial_tile(S, K, Cout, in_item, out_item, weight_bufs,
                       budget, max_tile, batch):
    """Largest lane-dense tile (multiple of 128, divides S) within the budget.

    Fallback is the SMALLEST lane-dense divisor (keeps double-buffering alive
    instead of returning the full extent).  Among fitting tiles, prefers one
    giving an even total grid (v7x: 2 TensorCores) if it costs at most a 2x
    smaller tile.
    """
    cands = [t for t in range(128, min(S, max_tile) + 1, 128) if S % t == 0]
    if not cands:
        return S  # tiny / odd extents: full-extent block (always legal)
    cands.sort(reverse=True)
    fitting = [t for t in cands
               if _vmem_bytes(t, K, Cout, in_item, out_item, weight_bufs) <= budget]
    if not fitting:
        return cands[-1]  # smallest lane-dense divisor
    best = fitting[0]
    if (batch * (S // best)) % 2 != 0:
        for t in fitting:
            if (batch * (S // t)) % 2 == 0 and 2 * t >= best:
                return t
    return best


# ---------------------------------------------------------------------------
# Main entry: both Conv2d(hidden, 2*hidden, kernel_size=2, stride=2)
# ---------------------------------------------------------------------------
def downsample_pair(x, skip, w_main, b_main, w_skip, b_skip, *,
                    compute_dtype=jnp.bfloat16, out_dtype=None, max_tile=None):
    """x, skip: (N, C, H, W) NCHW; w_*: (Cout, C, 2, 2) OIHW; b_*: (Cout,).
    Returns two (N, Cout, H//2, W//2) arrays."""
    N, C, H, W = x.shape
    assert H % 2 == 0 and W % 2 == 0, "H and W must be even for 2x2/stride-2"
    Cout = w_main.shape[0]
    OH, OW = H // 2, W // 2
    S = OH * OW
    K = C * 4
    if out_dtype is None:
        out_dtype = x.dtype

    # Lane-dense outputs: per-image spatial lanes when S is a multiple of 128,
    # otherwise fold the batch into the lane axis (deep DDPM stages, e.g. 8x8).
    collapse_batch = (S < 128) or (S % 128 != 0)
    B = 1 if collapse_batch else N
    S_eff = N * S if collapse_batch else S

    px = _space_to_depth(x, compute_dtype, collapse_batch)
    ps = _space_to_depth(skip, compute_dtype, collapse_batch)
    wx = w_main.reshape(Cout, K).astype(compute_dtype)
    ws = w_skip.reshape(Cout, K).astype(compute_dtype)
    bx = b_main.reshape(Cout, 1).astype(jnp.float32)
    bs = b_skip.reshape(Cout, 1).astype(jnp.float32)

    in_item = jnp.dtype(compute_dtype).itemsize
    out_item = jnp.dtype(out_dtype).itemsize

    # Generation-aware VMEM sizing (v5e/v6e: 128 MiB physical, v7x: 64 MiB).
    phys = _tpu_vmem_capacity_bytes()
    cap = max(phys - 8 * 2 ** 20, 24 * 2 ** 20)       # headroom for compiler scratch
    budget = min(phys * 3 // 4, 96 * 2 ** 20)         # tile-search budget
    if max_tile is None:
        max_tile = 2048 if phys >= 96 * 2 ** 20 else 1024

    # Constant-index weight blocks never need double buffers; only request
    # single buffering when the saved VMEM is big enough to matter.
    single_buf_weights = (hasattr(pl, "Buffered")
                          and 2 * 2 * Cout * K * in_item > 4 * 2 ** 20)
    weight_bufs = 1 if single_buf_weights else 2

    ts = _pick_spatial_tile(S_eff, K, Cout, in_item, out_item, weight_bufs,
                            budget, max_tile, B)
    est = _vmem_bytes(ts, K, Cout, in_item, out_item, weight_bufs)
    # Never clip below the actual working set; never exceed physical minus headroom.
    vmem_limit = int(min(cap, max(est + est // 2, 32 * 2 ** 20)))

    grid = (B, S_eff // ts)

    wkwargs = {"pipeline_mode": pl.Buffered(1)} if single_buf_weights else {}
    patch_spec = pl.BlockSpec((1, K, ts), lambda b, i: (b, 0, i))
    weight_spec = pl.BlockSpec((Cout, K), lambda b, i: (0, 0), **wkwargs)
    bias_spec = pl.BlockSpec((Cout, 1), lambda b, i: (0, 0))
    out_spec = pl.BlockSpec((1, Cout, ts), lambda b, i: (b, 0, i))

    flops = 4 * N * S * Cout * K  # both convs, 2 flops per MAC
    bytes_accessed = int((px.size + ps.size + wx.size + ws.size) * in_item
                         + (bx.size + bs.size) * 4
                         + 2 * B * Cout * S_eff * out_item)

    out_x, out_s = pl.pallas_call(
        _downsample_pair_kernel,
        out_shape=(jax.ShapeDtypeStruct((B, Cout, S_eff), out_dtype),
                   jax.ShapeDtypeStruct((B, Cout, S_eff), out_dtype)),
        grid_spec=pltpu.PrefetchScalarGridSpec(
            num_scalar_prefetch=0,
            grid=grid,
            in_specs=[patch_spec, patch_spec,
                      weight_spec, weight_spec,
                      bias_spec, bias_spec],
            out_specs=[out_spec, out_spec],
        ),
        compiler_params=pltpu.CompilerParams(
            dimension_semantics=("parallel", "parallel"),
            vmem_limit_bytes=vmem_limit,
        ),
        cost_estimate=pl.CostEstimate(
            flops=flops, transcendentals=0, bytes_accessed=bytes_accessed),
    )(px, ps, wx, ws, bx, bs)

    if collapse_batch:
        out_x = out_x.reshape(Cout, N, OH, OW).transpose(1, 0, 2, 3)
        out_s = out_s.reshape(Cout, N, OH, OW).transpose(1, 0, 2, 3)
    else:
        out_x = out_x.reshape(N, Cout, OH, OW)
        out_s = out_s.reshape(N, Cout, OH, OW)
    return out_x, out_s


def init_downsample_block(key, hidden, dtype=jnp.float32):
    """Deterministic params matching nn.Conv2d(hidden, 2*hidden, 2, 2) x2."""
    cout = 2 * hidden
    fan_in = hidden * 2 * 2
    bound = 1.0 / jnp.sqrt(fan_in)
    k1, k2, k3, k4 = jax.random.split(key, 4)
    return {
        "main_w": jax.random.uniform(k1, (cout, hidden, 2, 2), dtype, -bound, bound),
        "main_b": jax.random.uniform(k2, (cout,), dtype, -bound, bound),
        "skip_w": jax.random.uniform(k3, (cout, hidden, 2, 2), dtype, -bound, bound),
        "skip_b": jax.random.uniform(k4, (cout,), dtype, -bound, bound),
    }


@functools.partial(jax.jit, static_argnames=("compute_dtype", "out_dtype"))
def downsample_block_forward(params, x, skip,
                             compute_dtype=jnp.bfloat16, out_dtype=None):
    """Forward of DownsampleBlock: returns (main(x), skip_conv(skip))."""
    return downsample_pair(
        x, skip,
        params["main_w"], params["main_b"],
        params["skip_w"], params["skip_b"],
        compute_dtype=compute_dtype, out_dtype=out_dtype,
    )


def _reference_conv(x, w, b):
    y = jax.lax.conv_general_dilated(
        x, w, window_strides=(2, 2), padding="VALID",
        dimension_numbers=("NCHW", "OIHW", "NCHW"),
    )
    return y + b.reshape(1, -1, 1, 1)


if __name__ == "__main__":
    key = jax.random.PRNGKey(0)
    k_param, k_x, k_s = jax.random.split(key, 3)

    hidden = 4
    N, H, W = 2, 16, 16
    x = jax.random.normal(k_x, (N, hidden, H, W), jnp.float32)
    skip = jax.random.normal(k_s, (N, hidden, H, W), jnp.float32)
    params = init_downsample_block(k_param, hidden)

    x_ref = _reference_conv(x, params["main_w"], params["main_b"])
    s_ref = _reference_conv(skip, params["skip_w"], params["skip_b"])

    # Default path: bf16 operands, f32 accumulation, f32 outputs.  S = 64 < 128
    # so the batch is folded into the lane axis (lane-dense stores).
    x_out, s_out = downsample_block_forward(params, x, skip)
    jax.block_until_ready((x_out, s_out))
    assert x_out.shape == (N, 2 * hidden, H // 2, W // 2)
    assert s_out.shape == (N, 2 * hidden, H // 2, W // 2)
    assert jnp.allclose(x_out, x_ref, atol=5e-2, rtol=5e-2)
    assert jnp.allclose(s_out, s_ref, atol=5e-2, rtol=5e-2)

    # f32-operand path: tight tolerance.
    x32, s32 = downsample_block_forward(params, x, skip,
                                        compute_dtype=jnp.float32)
    jax.block_until_ready((x32, s32))
    assert jnp.allclose(x32, x_ref, atol=1e-5, rtol=1e-5)
    assert jnp.allclose(s32, s_ref, atol=1e-5, rtol=1e-5)

    # Larger spatial extent exercises the per-image lane layout (S >= 128),
    # the even-grid preference, and bf16 outputs.
    N2, H2, W2 = 1, 32, 32
    x2 = jax.random.normal(k_x, (N2, hidden, H2, W2), jnp.float32)
    s2 = jax.random.normal(k_s, (N2, hidden, H2, W2), jnp.float32)
    x2_ref = _reference_conv(x2, params["main_w"], params["main_b"])
    s2_ref = _reference_conv(s2, params["skip_w"], params["skip_b"])
    x2_out, s2_out = downsample_block_forward(params, x2, s2,
                                              out_dtype=jnp.bfloat16)
    jax.block_until_ready((x2_out, s2_out))
    assert x2_out.dtype == jnp.bfloat16
    assert jnp.allclose(x2_out.astype(jnp.float32), x2_ref, atol=5e-2, rtol=5e-2)
    assert jnp.allclose(s2_out.astype(jnp.float32), s2_ref, atol=5e-2, rtol=5e-2)

    print("KERNEL_OK")
</pallas_src>

<mosaic_0001>
module attributes {stable_mosaic.version = 11 : i64} {
  func.func @_downsample_pair_kernel(%arg0: i32, %arg1: i32, %arg2: memref<1x16x128xbf16, #tpu.memory_space<vmem>>, %arg3: memref<1x16x128xbf16, #tpu.memory_space<vmem>>, %arg4: memref<8x16xbf16, #tpu.memory_space<vmem>>, %arg5: memref<8x16xbf16, #tpu.memory_space<vmem>>, %arg6: memref<8x1xf32, #tpu.memory_space<vmem>>, %arg7: memref<8x1xf32, #tpu.memory_space<vmem>>, %arg8: memref<1x8x128xf32, #tpu.memory_space<vmem>>, %arg9: memref<1x8x128xf32, #tpu.memory_space<vmem>>) attributes {dimension_semantics = [#tpu.dimension_semantics<parallel>, #tpu.dimension_semantics<parallel>], iteration_bounds = array<i64: 1, 1>, scalar_prefetch = 0 : i64, scratch_operands = 0 : i64, tpu.core_type = #tpu.core_type<tc>, window_params = [{transform_indices = @transform_0, window_bounds = array<i64: 1, 16, 128>}, {transform_indices = @transform_1, window_bounds = array<i64: 1, 16, 128>}, {pipeline_mode = #tpu.pipeline_mode<synchronous>, transform_indices = @transform_2, window_bounds = array<i64: 8, 16>}, {pipeline_mode = #tpu.pipeline_mode<synchronous>, transform_indices = @transform_3, window_bounds = array<i64: 8, 16>}, {pipeline_mode = #tpu.pipeline_mode<synchronous>, transform_indices = @transform_4, window_bounds = array<i64: 8, 1>}, {pipeline_mode = #tpu.pipeline_mode<synchronous>, transform_indices = @transform_5, window_bounds = array<i64: 8, 1>}, {transform_indices = @transform_6, window_bounds = array<i64: 1, 8, 128>}, {transform_indices = @transform_7, window_bounds = array<i64: 1, 8, 128>}]} {
    %c0 = arith.constant 0 : index
    %c0_0 = arith.constant 0 : index
    %0 = vector.load %arg4[%c0, %c0_0] : memref<8x16xbf16, #tpu.memory_space<vmem>>, vector<8x16xbf16>
    %c0_1 = arith.constant 0 : index
    %c0_2 = arith.constant 0 : index
    %c0_3 = arith.constant 0 : index
    %1 = vector.load %arg2[%c0_1, %c0_2, %c0_3] : memref<1x16x128xbf16, #tpu.memory_space<vmem>>, vector<1x16x128xbf16>
    %2 = vector.shape_cast %1 : vector<1x16x128xbf16> to vector<16x128xbf16>
    %cst = arith.constant dense<0.000000e+00> : vector<8x128xf32>
    %3 = tpu.matmul %0, %2, %cst {dimension_numbers = #tpu.dot_dimension_numbers<[1], [0], [0], [1], [0, 0, 1, 1], [], []>} : vector<8x16xbf16>, vector<16x128xbf16>, vector<8x128xf32> -> vector<8x128xf32>
    %c0_4 = arith.constant 0 : index
    %c0_5 = arith.constant 0 : index
    %4 = vector.load %arg6[%c0_4, %c0_5] : memref<8x1xf32, #tpu.memory_space<vmem>>, vector<8x1xf32>
    %5 = vector.broadcast %4 : vector<8x1xf32> to vector<8x128xf32>
    %6 = arith.addf %3, %5 : vector<8x128xf32>
    %c0_6 = arith.constant 0 : index
    %c0_7 = arith.constant 0 : index
    %c0_8 = arith.constant 0 : index
    %7 = vector.load %arg8[%c0_6, %c0_7, %c0_8] : memref<1x8x128xf32, #tpu.memory_space<vmem>>, vector<1x8x128xf32>
    %8 = vector.shape_cast %7 : vector<1x8x128xf32> to vector<8x128xf32>
    %9 = vector.shape_cast %6 : vector<8x128xf32> to vector<1x8x128xf32>
    tpu.vector_store %arg8[%c0_6, %c0_7, %c0_8], %9 {strides = array<i32>} : memref<1x8x128xf32, #tpu.memory_space<vmem>>, vector<1x8x128xf32>,
    %c0_9 = arith.constant 0 : index
    %c0_10 = arith.constant 0 : index
    %10 = vector.load %arg5[%c0_9, %c0_10] : memref<8x16xbf16, #tpu.memory_space<vmem>>, vector<8x16xbf16>
    %c0_11 = arith.constant 0 : index
    %c0_12 = arith.constant 0 : index
    %c0_13 = arith.constant 0 : index
    %11 = vector.load %arg3[%c0_11, %c0_12, %c0_13] : memref<1x16x128xbf16, #tpu.memory_space<vmem>>, vector<1x16x128xbf16>
    %12 = vector.shape_cast %11 : vector<1x16x128xbf16> to vector<16x128xbf16>
    %cst_14 = arith.constant dense<0.000000e+00> : vector<8x128xf32>
    %13 = tpu.matmul %10, %12, %cst_14 {dimension_numbers = #tpu.dot_dimension_numbers<[1], [0], [0], [1], [0, 0, 1, 1], [], []>} : vector<8x16xbf16>, vector<16x128xbf16>, vector<8x128xf32> -> vector<8x128xf32>
    %c0_15 = arith.constant 0 : index
    %c0_16 = arith.constant 0 : index
    %14 = vector.load %arg7[%c0_15, %c0_16] : memref<8x1xf32, #tpu.memory_space<vmem>>, vector<8x1xf32>
    %15 = vector.broadcast %14 : vector<8x1xf32> to vector<8x128xf32>
    %16 = arith.addf %13, %15 : vector<8x128xf32>
    %c0_17 = arith.constant 0 : index
    %c0_18 = arith.constant 0 : index
    %c0_19 = arith.constant 0 : index
    %17 = vector.load %arg9[%c0_17, %c0_18, %c0_19] : memref<1x8x128xf32, #tpu.memory_space<vmem>>, vector<1x8x128xf32>
    %18 = vector.shape_cast %17 : vector<1x8x128xf32> to vector<8x128xf32>
    %19 = vector.shape_cast %16 : vector<8x128xf32> to vector<1x8x128xf32>
    tpu.vector_store %arg9[%c0_17, %c0_18, %c0_19], %19 {strides = array<i32>} : memref<1x8x128xf32, #tpu.memory_space<vmem>>, vector<1x8x128xf32>,
    return
  }
  func.func @transform_0(%arg0: i32, %arg1: i32) -> (i32, i32, i32) {
    %c0_i32 = arith.constant 0 : i32
    %c0_i32_0 = arith.constant 0 : i32
    return %arg0, %c0_i32, %arg1 : i32, i32, i32
  }
  func.func @transform_1(%arg0: i32, %arg1: i32) -> (i32, i32, i32) {
    %c0_i32 = arith.constant 0 : i32
    %c0_i32_0 = arith.constant 0 : i32
    return %arg0, %c0_i32, %arg1 : i32, i32, i32
  }
  func.func @transform_2(%arg0: i32, %arg1: i32) -> (i32, i32) {
    %c0_i32 = arith.constant 0 : i32
    %c0_i32_0 = arith.constant 0 : i32
    %c0_i32_1 = arith.constant 0 : i32
    return %c0_i32, %c0_i32_0 : i32, i32
  }
  func.func @transform_3(%arg0: i32, %arg1: i32) -> (i32, i32) {
    %c0_i32 = arith.constant 0 : i32
    %c0_i32_0 = arith.constant 0 : i32
    %c0_i32_1 = arith.constant 0 : i32
    return %c0_i32, %c0_i32_0 : i32, i32
  }
  func.func @transform_4(%arg0: i32, %arg1: i32) -> (i32, i32) {
    %c0_i32 = arith.constant 0 : i32
    %c0_i32_0 = arith.constant 0 : i32
    %c0_i32_1 = arith.constant 0 : i32
    return %c0_i32, %c0_i32_0 : i32, i32
  }
  func.func @transform_5(%arg0: i32, %arg1: i32) -> (i32, i32) {
    %c0_i32 = arith.constant 0 : i32
    %c0_i32_0 = arith.constant 0 : i32
    %c0_i32_1 = arith.constant 0 : i32
    return %c0_i32, %c0_i32_0 : i32, i32
  }
  func.func @transform_6(%arg0: i32, %arg1: i32) -> (i32, i32, i32) {
    %c0_i32 = arith.constant 0 : i32
    %c0_i32_0 = arith.constant 0 : i32
    return %arg0, %c0_i32, %arg1 : i32, i32, i32
  }
  func.func @transform_7(%arg0: i32, %arg1: i32) -> (i32, i32, i32) {
    %c0_i32 = arith.constant 0 : i32
    %c0_i32_0 = arith.constant 0 : i32
    return %arg0, %c0_i32, %arg1 : i32, i32, i32
  }
}

</mosaic_0001>

<bundles_post_ra>
// kernel: downsample_block_forward.1
= control target key start
LH: loop header
LB: loop body
LE: loop exit
PB: predicated region body
PF: predicated region fallthrough
CT: control target
= control target key end

     0   :  { %v179_v0 = vmov 0.0   ;;  %vm180_vm0 = vmmov 0   ;;  %vm41_vm1 = vcmask 130048   ;;  %v181_v4 = vmov 0   ;;  %s246_s0 = inlined_call_operand.vmem [shape: bf16[1,16,128], index: 0, kind: input, shape index: {}]   ;;  %s247_s1 = inlined_call_operand.vmem [shape: bf16[1,16,128], index: 1, kind: input, shape index: {}]   ;;  %s248_s2 = inlined_call_operand.vmem [shape: bf16[8,16], index: 2, kind: input, shape index: {}]   ;;  %s249_s4 = inlined_call_operand.vmem [shape: f32[8,1], index: 4, kind: input, shape index: {}]   ;;  %s250_s3 = inlined_call_operand.vmem [shape: bf16[8,16], index: 3, kind: input, shape index: {}]   ;;  %s251_s5 = inlined_call_operand.vmem [shape: f32[8,1], index: 5, kind: input, shape index: {}]   ;;  %s252_s6 = inlined_call_operand.vmem [shape: f32[1,8,128], index: 6, kind: output, shape index: {0}]   ;;  %s253_s7 = inlined_call_operand.vmem [shape: f32[1,8,128], index: 7, kind: output, shape index: {1}]  }
   0x1   :  { %161 = vmatprep.subr.bf16.mxu0 %v179_v0  ;;  %167 = vmatprep.subr.bf16.mxu1 %v179_v0  ;;  %v177_v1 = vld [vmem:[%s246_s0] sm:$0xff]  }
   0x2   :  { %v178_v2 = vld [vmem:[%s247_s1] sm:$0xff]   ;;  %163 = vmatprep.mubr.msk.bf16.mxu0 %vm180_vm0, %v179_v0  ;;  %169 = vmatprep.mubr.msk.bf16.mxu1 %vm180_vm0, %v179_v0 }
   0x3   :  { %162 = vmatpush3.bf16.msra.mxu0 %v177_v1  ;;  %v26_v3 = vld [vmem:[%s248_s2] sm:$0xf]  ;;  %176 = vset.pattern.permute.xlu0 %v181_v4 }
   0x4   :  { %v29_v5 = vld [vmem:[%s249_s4] sm:$0xff]  ;;  %168 = vmatpush3.bf16.msra.mxu1 %v178_v2 }
   0x5   :  { %v86_v6 = vld [vmem:[%s250_s3] sm:$0xf]  ;;  %32 = vperm.xlu0 %176, %v29_v5  }
   0x6   :  { %v89_v7 = vld [vmem:[%s251_s5] sm:$0xff]  ;;  %164 = vmatmul.mubr.msk.bf16.vlgmr.msra.gmra.mrb[0].mxu0 %vm41_vm1, %v26_v3 }
   0x7   :  { %170 = vmatmul.mubr.msk.bf16.vlgmr.msra.gmra.mrb[0].mxu1 %vm41_vm1, %v86_v6 }
   0x9   :  { %92 = vperm.xlu0 %176, %v89_v7  }
  0x84   :  { %v33_v8 = vpop.permute.xlu0 %32 }
  0x88   :  { %v93_v9 = vpop.permute.xlu0 %92 }
  0xd9   :  { %v79_v10 = vpop.f32.mrb[0].mxu0 }
  0xda   :  { %v80_v11 = vadd.f32 %v79_v10, %v33_v8  ;;  %v138_v12 = vpop.f32.mrb[0].mxu1  ;;  %v165_v13 = vpop.f32.mrb[1].mxu0 }
  0xdb   :  { %v139_v14 = vadd.f32 %v138_v12, %v93_v9  ;;  %v171_v15 = vpop.f32.mrb[1].mxu1  ;;  %v82_v16 = vpop.f32.mrb[2].mxu0 }
  0xdc   :  { %85 = vst [vmem:[%s252_s6] sm:$0xff] %v80_v11  ;;  %v141_v17 = vpop.f32.mrb[2].mxu1  ;;  %v166_v18 = vpop.f32.mrb[3].mxu0 }
  0xdd   :  { %144 = vst [vmem:[%s253_s7] sm:$0xff] %v139_v14  ;;  %v172_v19 = vpop.f32.mrb[3].mxu1 }

</bundles_post_ra>
